<compile_context>
chip_gen: v7x
topology: tpu7x:2x2x1
jax: 0.10.0
libtpu: 0.0.40
codegen_flags: <defaults>
</compile_context>

<pallas_src>
import functools

import jax
import jax.numpy as jnp
from jax.experimental import pallas as pl
from jax.experimental.pallas import tpu as pltpu


def _round_up(a, b):
    return (a + b - 1) // b * b


def _dense_kernel(seed_ref, x_ref, w_ref, b_ref, o_ref, *,
                  dropout_rate, training, n_pad):
    # x_ref: (tm, D_in)  w_ref: (D_in, tn)  b_ref: (1, tn)  o_ref: (tm, tn)
    y = jnp.dot(x_ref[...], w_ref[...], preferred_element_type=jnp.float32)
    y = y + b_ref[...]                     # bias broadcast over batch rows
    y = jnp.maximum(y, 0.0)                # ReLU

    if training and dropout_rate > 0.0:
        # Counter-based hash PRNG keyed on the *global* element index so every
        # grid tile draws an independent stream (no shared-seed correlation).
        i = pl.program_id(0)
        j = pl.program_id(1)
        tm, tn = o_ref.shape
        rows = jax.lax.broadcasted_iota(jnp.int32, (tm, tn), 0) + i * tm
        cols = jax.lax.broadcasted_iota(jnp.int32, (tm, tn), 1) + j * tn
        ctr = (rows * n_pad + cols).astype(jnp.uint32)
        seed_u = seed_ref[0].astype(jnp.uint32)
        h = ctr + seed_u * jnp.uint32(0x9E3779B9)
        # lowbias32 integer hash (all 32-bit VPU ops).
        h = h ^ (h >> 16)
        h = h * jnp.uint32(0x7FEB352D)
        h = h ^ (h >> 15)
        h = h * jnp.uint32(0x846CA68B)
        h = h ^ (h >> 16)
        r = (h >> 8).astype(jnp.int32)                      # uniform in [0, 2^24)
        thresh = jnp.int32(int(round(dropout_rate * (1 << 24))))
        scale = jnp.float32(1.0 / (1.0 - dropout_rate))
        y = jnp.where(r >= thresh, y * scale, 0.0)          # single select+mul

    o_ref[...] = y.astype(o_ref.dtype)


def prepare_dense_params(weight):
    """One-time (init-time) transpose of a PyTorch-layout (D_out, D_in) weight
    to the kernel's (D_in, D_out) layout.  Do NOT call this per forward."""
    return jnp.asarray(weight).T


def dense_module_forward(x, weight_t, bias, *, dropout_rate=0.1, training=False,
                         seed=0, tm=128, tn=256):
    """x: (B, D_in) f32; weight_t: (D_in, D_out) (pre-transposed); bias: (D_out,)."""
    B, D_in = x.shape
    D_in_w, D_out = weight_t.shape
    assert D_in == D_in_w, "weight_t must be (D_in, D_out)"

    # Tile sizes: sublane-aligned batch tiles, lane-dense (>=128) output tiles.
    tm = min(tm, _round_up(B, 8))
    tn = min(tn, _round_up(D_out, 128))
    B_pad = _round_up(B, tm)
    N_pad = _round_up(D_out, tn)

    if B_pad != B:
        x = jnp.pad(x, ((0, B_pad - B), (0, 0)))
    if N_pad != D_out:
        weight_t = jnp.pad(weight_t, ((0, 0), (0, N_pad - D_out)))
        bias = jnp.pad(bias, (0, N_pad - D_out))
    b2 = bias.reshape(1, N_pad)
    seed_arr = jnp.array([seed], dtype=jnp.int32)

    grid = (B_pad // tm, N_pad // tn)

    kernel = functools.partial(
        _dense_kernel,
        dropout_rate=float(dropout_rate),
        training=bool(training),
        n_pad=int(N_pad),
    )

    # VMEM budget for the chosen tiles (double-buffered inputs/outputs + headroom).
    tile_bytes = 4 * (tm * D_in + D_in * tn + tn + tm * tn)
    vmem_limit = int(min(64 * 2**20, max(8 * 2**20, 4 * tile_bytes)))

    out = pl.pallas_call(
        kernel,
        out_shape=jax.ShapeDtypeStruct((B_pad, N_pad), x.dtype),
        grid_spec=pltpu.PrefetchScalarGridSpec(
            num_scalar_prefetch=1,                 # seed lands in SMEM
            grid=grid,
            in_specs=[
                pl.BlockSpec((tm, D_in), lambda i, j, seed: (i, 0)),
                pl.BlockSpec((D_in, tn), lambda i, j, seed: (0, j)),
                pl.BlockSpec((1, tn), lambda i, j, seed: (0, j)),
            ],
            out_specs=pl.BlockSpec((tm, tn), lambda i, j, seed: (i, j)),
        ),
        compiler_params=pltpu.CompilerParams(
            dimension_semantics=("parallel", "parallel"),  # megacore-friendly
            vmem_limit_bytes=vmem_limit,
        ),
        cost_estimate=pl.CostEstimate(
            flops=2 * B_pad * D_in * N_pad,
            transcendentals=0,
            bytes_accessed=4 * (B_pad * D_in + D_in * N_pad + N_pad + B_pad * N_pad),
        ),
    )(seed_arr, x, weight_t, b2)

    return out[:B, :D_out]


if __name__ == "__main__":
    # Small shapes consistent with DenseModule(input_size=32, output_size=128).
    B, D_in, D_out = 32, 32, 128
    key = jax.random.PRNGKey(0)
    kx, kw, kb = jax.random.split(key, 3)

    x = jax.random.normal(kx, (B, D_in), dtype=jnp.float32)
    # PyTorch-style Linear parameters (weight stored (D_out, D_in)).
    bound = 1.0 / (D_in ** 0.5)
    weight = jax.random.uniform(kw, (D_out, D_in), minval=-bound, maxval=bound,
                                dtype=jnp.float32)
    bias = jax.random.uniform(kb, (D_out,), minval=-bound, maxval=bound,
                              dtype=jnp.float32)

    # One-time parameter prep (transpose happens once, not per forward call).
    w_t = prepare_dense_params(weight)               # (D_in, D_out)

    # Eval-mode forward (dropout = identity) -- matches nn.Dropout in eval().
    # tm=8 / tn=128 => grid=(4, 1): exercises the tiled, pipelined path.
    out = dense_module_forward(x, w_t, bias, dropout_rate=0.1, training=False,
                               tm=8, tn=128)
    out = jax.block_until_ready(out)

    # Pure-JAX reference check.
    ref = jnp.maximum(x @ weight.T + bias, 0.0)
    assert jnp.allclose(out, ref, atol=1e-5, rtol=1e-5), "mismatch vs reference"

    # Training-mode (in-kernel dropout) path: every element must be either
    # dropped (0) or the reference value scaled by 1/(1-p).
    p = 0.1
    out_train = dense_module_forward(x, w_t, bias, dropout_rate=p, training=True,
                                     seed=42, tm=8, tn=128)
    out_train = jax.block_until_ready(out_train)
    ok = jnp.all(jnp.isclose(out_train, 0.0)
                 | jnp.isclose(out_train * (1.0 - p), ref, atol=1e-4))
    assert bool(ok), "training-mode dropout output inconsistent with reference"

    print("KERNEL_OK")
</pallas_src>

<mosaic_0001>
module attributes {stable_mosaic.version = 11 : i64} {
  func.func @_dense_kernel(%arg0: i32, %arg1: i32, %arg2: memref<1xi32, #tpu.memory_space<smem>>, %arg3: memref<8x32xf32, #tpu.memory_space<vmem>>, %arg4: memref<32x128xf32, #tpu.memory_space<vmem>>, %arg5: memref<1x128xf32, #tpu.memory_space<vmem>>, %arg6: memref<8x128xf32, #tpu.memory_space<vmem>>) attributes {dimension_semantics = [#tpu.dimension_semantics<parallel>, #tpu.dimension_semantics<parallel>], iteration_bounds = array<i64: 4, 1>, scalar_prefetch = 1 : i64, scratch_operands = 0 : i64, tpu.core_type = #tpu.core_type<tc>, window_params = [{transform_indices = @transform_0, window_bounds = array<i64: 8, 32>}, {transform_indices = @transform_1, window_bounds = array<i64: 32, 128>}, {transform_indices = @transform_2, window_bounds = array<i64: 1, 128>}, {transform_indices = @transform_3, window_bounds = array<i64: 8, 128>}]} {
    %c0 = arith.constant 0 : index
    %c0_0 = arith.constant 0 : index
    %0 = vector.load %arg3[%c0, %c0_0] : memref<8x32xf32, #tpu.memory_space<vmem>>, vector<8x32xf32>
    %c0_1 = arith.constant 0 : index
    %c0_2 = arith.constant 0 : index
    %1 = vector.load %arg4[%c0_1, %c0_2] : memref<32x128xf32, #tpu.memory_space<vmem>>, vector<32x128xf32>
    %cst = arith.constant dense<0.000000e+00> : vector<8x128xf32>
    %2 = tpu.matmul %0, %1, %cst {dimension_numbers = #tpu.dot_dimension_numbers<[1], [0], [0], [1], [0, 0, 1, 1], [], []>} : vector<8x32xf32>, vector<32x128xf32>, vector<8x128xf32> -> vector<8x128xf32>
    %c0_3 = arith.constant 0 : index
    %c0_4 = arith.constant 0 : index
    %3 = vector.load %arg5[%c0_3, %c0_4] : memref<1x128xf32, #tpu.memory_space<vmem>>, vector<1x128xf32>
    %4 = vector.broadcast %3 : vector<1x128xf32> to vector<8x128xf32>
    %5 = arith.addf %2, %4 : vector<8x128xf32>
    %cst_5 = arith.constant 0.000000e+00 : f32
    %6 = vector.broadcast %cst_5 : f32 to vector<8x128xf32>
    %7 = arith.maximumf %5, %6 : vector<8x128xf32>
    %c0_6 = arith.constant 0 : index
    %c0_7 = arith.constant 0 : index
    %8 = vector.load %arg6[%c0_6, %c0_7] : memref<8x128xf32, #tpu.memory_space<vmem>>, vector<8x128xf32>
    tpu.vector_store %arg6[%c0_6, %c0_7], %7 {strides = array<i32>} : memref<8x128xf32, #tpu.memory_space<vmem>>, vector<8x128xf32>,
    return
  }
  func.func @transform_0(%arg0: i32, %arg1: i32, %arg2: memref<1xi32, #tpu.memory_space<smem>>) -> (i32, i32) {
    %c0_i32 = arith.constant 0 : i32
    %c0_i32_0 = arith.constant 0 : i32
    return %arg0, %c0_i32 : i32, i32
  }
  func.func @transform_1(%arg0: i32, %arg1: i32, %arg2: memref<1xi32, #tpu.memory_space<smem>>) -> (i32, i32) {
    %c0_i32 = arith.constant 0 : i32
    %c0_i32_0 = arith.constant 0 : i32
    return %c0_i32, %arg1 : i32, i32
  }
  func.func @transform_2(%arg0: i32, %arg1: i32, %arg2: memref<1xi32, #tpu.memory_space<smem>>) -> (i32, i32) {
    %c0_i32 = arith.constant 0 : i32
    %c0_i32_0 = arith.constant 0 : i32
    return %c0_i32, %arg1 : i32, i32
  }
  func.func @transform_3(%arg0: i32, %arg1: i32, %arg2: memref<1xi32, #tpu.memory_space<smem>>) -> (i32, i32) {
    %c0_i32 = arith.constant 0 : i32
    return %arg0, %arg1 : i32, i32
  }
}

</mosaic_0001>

<bundles_post_ra>
// kernel: tpu_custom_call.1
= control target key start
LH: loop header
LB: loop body
LE: loop exit
PB: predicated region body
PF: predicated region fallthrough
CT: control target
= control target key end

     0   :  { %10 = vsyncpa [#allocation5], 0  ;;  %s956_s0 = inlined_call_operand.<no memory space> [shape: s32[1], index: 0, kind: input, shape index: {}]   ;;  %s957_s1 = inlined_call_operand.hbm [shape: f32[32,32], index: 1, kind: input, shape index: {}]   ;;  %s958_s2 = inlined_call_operand.hbm [shape: f32[32,128], index: 2, kind: input, shape index: {}]   ;;  %s959_s3 = inlined_call_operand.vmem [shape: f32[1,128], index: 3, kind: input, shape index: {}]   ;;  %s960_s4 = inlined_call_operand.hbm [shape: f32[32,128], index: 4, kind: output, shape index: {}]  }
   0x1   :  { %12 = vsyncpa [#allocation5 + $0x1], 0 }
   0x2   :  { %13 = vsyncpa [#allocation8], 0 }
   0x3   :  { %14 = vsyncpa [#allocation6], 0 }
   0x4   :  { %16 = vsyncpa [#allocation6 + $0x1], 0  ;;  %s741_s15 = smov 0   ;;  %s743_s0 = smov 0  }
   0x5   :  { %s745_s16 = smov 0   ;;  %s747_s17 = smov 0  }
   0x6   :  { %s749_s18 = smov 0   ;;  %s751_s19 = smov 0  }
   0x7 LB: > { %s444_s20 = sadd.s32 4294967295, %s706_s19   ;;  %s445_s21 = sadd.s32 4294967294, %s706_s19   ;;  %s706_s19 = sphi %s751_s19, %s22_s19   ;;  %s702_s18 = sphi %s749_s18, %s983_s18   ;;  %s698_s17 = sphi %s747_s17, %s982_s17   ;;  %s694_s16 = sphi %s745_s16, %s981_s16   ;;  %s690_s0 = sphi %s743_s0, %s980_s0   ;;  %s686_s15 = sphi %s741_s15, %s979_s15  }
   0x8   : > { %p54_p0 = scmp.ne.s32.totalorder %s690_s0, %s686_s15  ;;  %p775_p1 = scmp.eq.s32.totalorder %s444_s20, 0 }
   0x9   : > { %p779_p2 = scmp.eq.s32.totalorder %s444_s20, 3  ;;  %p138_p3 = scmp.eq.s32.totalorder %s445_s21, 3 }
   0xa   : > { %s965_s22 = scalar_select %p775_p1, 1, 0 }
   0xb   : > { %s966_s23 = scalar_select %p779_p2, 1, 0 }
   0xc   : > { %p785_p4 = por %p775_p1, %p54_p0  ;;  %p446_p5 = scmp.ge.s32.totalorder %s706_s19, 1 }
   0xd   : > { %p790_p6 = por %p138_p3, %p54_p0  ;;  %p145_p7 = scmp.lt.s32.totalorder %s706_s19, 5 }
   0xe   : > { %s967_s24 = scalar_select %p785_p4, 1, 0 }
   0xf   : > { %s968_s25 = scalar_select %p790_p6, 1, 0 }
  0x10   : > { %p795_p8 = pnand %p446_p5, %p145_p7  ;;  %s708_s27 = smov [#allocation7]  }
  0x11   : > { %s159_s28 = sshll.u32 %s708_s27, 4  ;;  %s34_s30 = sadd.s32 1, %s702_s18  ;;  %s160_s28 = int_to_ptr.vmem [resolvable:$true] %s159_s28 }
  0x12   : > { %s969_s26 = scalar_select %p795_p8, 1, 0 }
  0x13   : > { %p492_p9 = pneg %p795_p8  ;;  %s562_s7 = scalar_lea.hbm %s958_s2, 512 }
  0x14   : > { %p563_p11 = scmp.ne.s32.totalorder %s958_s2, %s562_s7  ;;  %p569_p3 = scmp.lt.u32.totalorder %s562_s7, %s958_s2 }
  0x15   : > { %p803_p10 = pnand %p492_p9, %p775_p1 }
  0x17   : > { %p564_p12 = pneg %p803_p10 }
  0x19   : > { %p565_p13 = pnand %p564_p12, %p563_p11 }
  0x1b   : > { %p566_p0 = pneg %p565_p13 }
  0x1d   : > { %p571_p5 = pnand %p569_p3, %p566_p0 }
  0x1f   : > { %574 = shalt.err (!%p571_p5)
}
  0x20   : > { %s575_s12 = scalar_lea.vmem %s160_s28, 512  ;;  %p583_p1 = scmp.lt.s32.totalorder %s160_s28, %s160_s28 }
  0x21   : > { %p576_p7 = scmp.ne.s32.totalorder %s160_s28, %s575_s12  ;;  %p584_p4 = scmp.lt.s32.totalorder %s575_s12, %s575_s12 }
  0x23   : > { %p578_p9 = pnand %p576_p7, %p564_p12  ;;  %p585_p8 = por %p584_p4, %p583_p1 }
  0x25   : > { %p579_p6 = pneg %p578_p9 }
  0x27   : > { %p586_p2 = pnand %p585_p8, %p579_p6 }
  0x29   : > { %589 = shalt.err (!%p586_p2)
}
  0x2a   : > { %s709_s13 = smov 128   ;;  %s710_s14 = smov 8  }
  0x2b   : > { %495 = dma.hbm_to_vmem [thread:$0]  (!%p803_p10), %s958_s2, 512, %s160_s28, [#allocation8], %s709_s13, %s709_s13, %s710_s14  }
  0x2c   : > { %p36_p1 = scmp.ge.s32.totalorder %s34_s30, 4  ;;  %s41_s27 = sadd.s32 1, %s694_s16 }
  0x2d   : > { %p48_p2 = scmp.ne.s32.totalorder %s694_s16, %s690_s0  ;;  %p49_p4 = scmp.eq.s32.totalorder %s706_s19, 0 }
  0x2e   : > { %s985_s30 = smov (%p36_p1, %s34_s30), 0  ;;  %p972_p8 = scmp.ne.s32.totalorder %s966_s23, 0 }
  0x2f   : > { %p830_p6 = por %p49_p4, %p48_p2  ;;  %s38_s29 = ssub.s32 %s702_s18, %s985_s30 }
  0x30   : > { %p836_p11 = por %p972_p8, %p48_p2  ;;  %p505_p12 = scmp.lt.s32.totalorder %s706_s19, 4 }
  0x31   : > { %p39_p10 = scmp.eq.s32.totalorder %s38_s29, 0  ;;  %s179_s28 = sand.u32 1, %s694_s16  }
  0x32   : > { %s450_s7 = sshll.u32 %s179_s28, 3  ;;  %s451_s9 = sshll.u32 %s702_s18, 7 }
  0x33   : > { %s845_s8 = scalar_select %p39_p10, %s694_s16, %s41_s27  }
  0x34   : > { %s851_s12 = scalar_lea.hbm %s957_s1, %s451_s9  ;;  %s183_s23 = scalar_lea.vmem [#allocation4], %s450_s7 }
  0x35   : > { %s190_s13 = sshll.u32 %s183_s23, 4  ;;  %p857_p13 = pnand %p505_p12, %p830_p6  ;;  %s853_s13 = int_to_ptr.vmem [resolvable:$true] %s190_s13 }
  0x36   : > { %s180_s20 = scalar_lea.sflag [#allocation5], %s179_s28  ;;  %s590_s21 = scalar_lea.hbm %s851_s12, 128 }
  0x37   : > { %p591_p0 = scmp.ne.s32.totalorder %s851_s12, %s590_s21  ;;  %p592_p3 = pneg %p857_p13 }
  0x38   : > { %s595_s7 = scalar_lea.hbm %s957_s1, 512  ;;  %p596_p9 = scmp.lt.u32.totalorder %s851_s12, %s957_s1 }
  0x39   : > { %p593_p5 = pnand %p592_p3, %p591_p0  ;;  %p597_p1 = scmp.lt.u32.totalorder %s595_s7, %s590_s21 }
  0x3a   : > { %p599_p4 = scmp.lt.u32.totalorder %s590_s21, %s851_s12 }
  0x3b   : > { %p594_p7 = pneg %p593_p5  ;;  %p598_p2 = por %p597_p1, %p596_p9 }
  0x3d   : > { %p600_p6 = por %p599_p4, %p598_p2 }
  0x3f   : > { %p601_p8 = pnand %p600_p6, %p594_p7 }
  0x41   : > { %604 = shalt.err (!%p601_p8)
}
  0x42   : > { %s605_s28 = scalar_lea.vmem %s853_s13, 128  ;;  %s711_s10 = smov [#allocation4]  }
  0x43   : > { %p606_p12 = scmp.ne.s32.totalorder %s853_s13, %s605_s28  ;;  %s610_s11 = sshll.u32 %s711_s10, 4  ;;  %s611_s11 = int_to_ptr.vmem [resolvable:$false] %s610_s11 }
  0x44   : > { %s612_s23 = scalar_lea.vmem %s611_s11, 256  ;;  %p613_p5 = scmp.lt.s32.totalorder %s853_s13, %s611_s11 }
  0x45   : > { %p608_p10 = pnand %p606_p12, %p592_p3  ;;  %p614_p9 = scmp.lt.s32.totalorder %s612_s23, %s605_s28 }
  0x47   : > { %p609_p0 = pneg %p608_p10  ;;  %p615_p1 = por %p614_p9, %p613_p5 }
  0x49   : > { %p616_p2 = pnand %p615_p1, %p609_p0 }
  0x4b   : > { %619 = shalt.err (!%p616_p2)
}
  0x4c   : > { %499 = dma.hbm_to_vmem [thread:$0]  (!%p857_p13), %s851_s12, 128, %s853_s13, %s180_s20  }
  0x4d   : > { %p975_p7 = scmp.ne.s32.totalorder %s969_s26, 0 }
  0x4e   : > { %s889_s21 = sand.u32 (!%p975_p7), 1, %s690_s0   ;;  %p976_p3 = scmp.ne.s32.totalorder (!%p975_p7), %s967_s24, 0 }
  0x4f   : > { %199 = sbr.rel (%p975_p7) target bundleno = 331 (0x14b), region = 32  ;;  %s453_s27 = sshll.u32 (!%p975_p7), %s889_s21, 3 }
  0x50   : > { %s202_s29 = scalar_lea.sflag (!%p975_p7), [#allocation5], %s889_s21  ;;  %s205_s7 = scalar_lea.vmem (!%p975_p7), [#allocation4], %s453_s27 }
  0x56   : > { %673 = dma.done.wait (%p976_p3), %s202_s29, 128  }
  0x57   : > { %675 = vsyncadd (%p976_p3), %s202_s29, 4294967168  ;;  %p977_p4 = scmp.ne.s32.totalorder %s965_s22, 0 }
  0x59   : > { %677 = dma.done.wait (%p977_p4), [#allocation8], 512  }
  0x5a   : > { %679 = vsyncadd (%p977_p4), [#allocation8], 4294966784  ;;  %v712_v0 = vmov 0.0|0.0   ;;  %vm713_vm0 = vmmov 0   ;;  %v714_v1 = vmov 0.0   ;;  %v239_v2 = vld [vmem:[#allocation7] sm:$0xff] }
  0x5b   : > { %478 = vmatprep.subr.bf16.mxu0 %v712_v0  ;;  %475 = vmatprep.mubr.msk.f32.mxu0 %vm713_vm0, %v714_v1  ;;  %v240_v3 = vld [vmem:[#allocation7 + $0x8] sm:$0xff]  ;;  %v241_v4 = vld [vmem:[#allocation7 + $0x10] sm:$0xff]  ;;  %v242_v6 = vld [vmem:[#allocation7 + $0x18] sm:$0xff]  ;;  %vm250_vm1 = vcmask 261120   ;;  %s459_s26 = sshll.u32 %s698_s17, 7  ;;  %s234_s12 = scalar_lea.vmem [#allocation9], %s453_s27 }
  0x5c   : > { %v479_v5 = vpack.c.bf16 %v240_v3, %v239_v2  ;;  %v482_v7 = vpack.c.bf16 %v242_v6, %v241_v4  ;;  %v238_v8 = vld [vmem:[%s205_s7] sm:$0xff]  ;;  %s341_s13 = sshll.u32 %s234_s12, 4  ;;  %s908_s5 = scalar_lea.hbm %s960_s4, %s459_s26  ;;  %s910_s13 = int_to_ptr.vmem [resolvable:$true] %s341_s13 }
  0x5d   : > { %v456_v9 = vld [vmem:[%s959_s3] ss:$0 sm:$0xff]  ;;  %s327_s9 = scalar_lea.sflag [#allocation6], %s889_s21  ;;  %s620_s28 = scalar_lea.vmem %s910_s13, 128 }
  0x5e   : > { %480 = vmatpush3.bf16.msra.mxu0 %v479_v5  ;;  %p621_p13 = scmp.ne.s32.totalorder %s910_s13, %s620_s28  ;;  %s715_s17 = smov [#allocation9]  }
  0x5f   : > { %481 = vmatprep.subr.bf16.mxu0 %v712_v0  ;;  %s624_s10 = sshll.u32 %s715_s17, 4  ;;  %s625_s10 = int_to_ptr.vmem [resolvable:$false] %s624_s10 }
  0x60   : > { %p622_p6 = pnand %p621_p13, %p836_p11  ;;  %s626_s11 = scalar_lea.vmem %s625_s10, 256 }
  0x61   : > { %p627_p12 = scmp.lt.s32.totalorder %s910_s13, %s625_s10  ;;  %p628_p10 = scmp.lt.s32.totalorder %s626_s11, %s620_s28 }
  0x62   : > { %483 = vmatpush3.bf16.msra.mxu0 %v482_v7  ;;  %p623_p8 = pneg %p622_p6 }
  0x63   : > { %p629_p0 = por %p628_p10, %p627_p12 }
  0x65   : > { %476 = vmatmul.mubr.msk.f32.vlgmr.msra.gmra.mrb[0].mxu0 %vm250_vm1, %v238_v8  ;;  %p630_p5 = pnand %p629_p0, %p623_p8 }
 0x138   : > { %v320_v10 = vpop.f32.mrb[0].mxu0 }
 0x139   : > { %v321_v11 = vadd.f32 %v456_v9, %v320_v10  ;;  %v477_v12 = vpop.f32.mrb[1].mxu0 }
 0x13b   : > { %v324_v13 = vmax.f32 %v321_v11, 0.0 }
 0x13d   : > { %325 = vst [vmem:[%s234_s12] sm:$0xff] %v324_v13 }
 0x13e   : > { %633 = shalt.err (!%p630_p5)
}
 0x13f   : > { %s634_s23 = scalar_lea.hbm %s908_s5, 128  ;;  %s638_s29 = scalar_lea.hbm %s960_s4, 512 }
 0x140   : > { %p635_p9 = scmp.ne.s32.totalorder %s908_s5, %s634_s23  ;;  %p639_p7 = scmp.lt.u32.totalorder %s908_s5, %s960_s4 }
 0x141   : > { %p640_p3 = scmp.lt.u32.totalorder %s638_s29, %s634_s23  ;;  %p642_p13 = scmp.lt.u32.totalorder %s634_s23, %s908_s5 }
 0x142   : > { %p636_p1 = pnand %p635_p9, %p836_p11 }
 0x143   : > { %p641_p4 = por %p640_p3, %p639_p7 }
 0x144   : > { %p637_p2 = pneg %p636_p1 }
 0x145   : > { %p643_p6 = por %p642_p13, %p641_p4 }
 0x147   : > { %p644_p8 = pnand %p643_p6, %p637_p2 }
 0x149   : > { %647 = shalt.err (!%p644_p8)
}
 0x14a   : > { %490 = dma.vmem_to_hbm [thread:$0]  (%p836_p11), %s910_s13, 128, %s908_s5, %s327_s9  }
 0x14b PF: > { %p507_p12 = scmp.ge.s32.totalorder %s706_s19, 2  ;;  %s353_s24 = sand.u32 1, %s686_s15  }
 0x14c   : > { %p978_p10 = scmp.ne.s32.totalorder %s968_s25, 0  ;;  %s354_s26 = scalar_lea.sflag [#allocation6], %s353_s24 }
 0x14e   : > { %p501_p0 = pnand %p507_p12, %p978_p10 }
 0x150   : > { %681 = dma.done.wait (!%p501_p0), %s354_s26, 128  }
 0x151   : > { %683 = vsyncadd (!%p501_p0), %s354_s26, 4294967168  ;;  %s22_s19 = sadd.s32 1, %s706_s19   ;;  %s979_s15 = smov %s690_s0 }
 0x152   : > { %p19_p5 = scmp.ge.s32.totalorder %s22_s19, 6   ;;  %s980_s0 = smov %s694_s16 }
 0x153   : > { %s981_s16 = smov %s845_s8  ;;  %s982_s17 = smov %s702_s18 }
 0x154   : > { %s983_s18 = smov %s985_s30  ;;  %21 = sbr.rel (!%p19_p5) target bundleno = 7 (0x7), region = 85 }
 0x15b   :  { %359 = vsyncpa [#allocation5], 1 }
 0x15c   :  { %361 = vsyncpa [#allocation5 + $0x1], 1 }
 0x15d   :  { %362 = vsyncpa [#allocation8], 1 }
 0x15e   :  { %363 = vsyncpa [#allocation6], 1 }
 0x15f   :  { %365 = vsyncpa [#allocation6 + $0x1], 1 }

</bundles_post_ra>
